<compile_context>
chip_gen: v7x
topology: tpu7x:2x2x1
jax: 0.10.0
libtpu: 0.0.40
codegen_flags: <defaults>
</compile_context>

<pallas_src>
import functools

import jax
import jax.numpy as jnp
from jax.experimental import pallas as pl
from jax.experimental.pallas import tpu as pltpu

EPS = 1e-5  # nn.LayerNorm default eps


# ----------------------------------------------------------------------------
# kernel: BW windows per grid step
# ----------------------------------------------------------------------------
def sgu_kernel(x_ref, g_ref, b_ref, w_ref, bias_ref, o_ref, *, c_half):
    # Load tile; all LayerNorm / gating math in f32 (v5e has no bf16 VPU).
    x = x_ref[...].astype(jnp.float32)              # (BW, N, C)
    u = x[..., :c_half]                             # (BW, N, C/2) lane-aligned if C/2 % 128 == 0
    v = x[..., c_half:]                             # (BW, N, C/2)

    # One-pass LayerNorm over the channel half: var = E[v^2] - E[v]^2.
    inv_c = 1.0 / c_half
    s1 = jnp.sum(v, axis=-1, keepdims=True)
    s2 = jnp.sum(v * v, axis=-1, keepdims=True)
    mu = s1 * inv_c
    var = jnp.maximum(s2 * inv_c - mu * mu, 0.0)
    rstd = jax.lax.rsqrt(var + EPS)
    v = (v - mu) * rstd
    v = v * g_ref[0] + b_ref[0]                     # gamma/beta broadcast over (BW, N)

    # Token mixing: out[b, p, c] = sum_q W[p, q] * v[b, q, c]  (torch Linear(n, n)
    # applied along the token axis). One batched MXU matmul over the BW windows.
    # W arrives already in its compute dtype (bf16 cast hoisted to the wrapper);
    # operands matched to it, f32 accumulation via preferred_element_type.
    w = w_ref[...]                                  # (N, N)
    bw, n = v.shape[0], v.shape[1]
    v_op = v.astype(w.dtype)
    w_b = jnp.broadcast_to(w, (bw, n, n))
    vm = jnp.einsum("bpq,bqc->bpc", w_b, v_op,
                    preferred_element_type=jnp.float32)
    # bias_ref already holds (Dense_0 bias + 1.0), so the gate "+1.0" is folded in.
    vm = vm + bias_ref[...][None]                   # (N,1) -> (1,N,1)

    o_ref[...] = (u * vm).astype(o_ref.dtype)


# ----------------------------------------------------------------------------
# wrapper helpers
# ----------------------------------------------------------------------------
def _device_kind():
    try:
        return jax.devices()[0].device_kind.lower()
    except Exception:
        return ""


def _choose_block_windows(m, n, c, in_itemsize, target_bytes):
    """Largest window-count whose (BW, N, C) input tile fits the per-tile budget,
    while keeping >= 4 grid steps when possible (v7x megacore + prefetch overlap)."""
    bytes_per_window = max(1, n * c * in_itemsize)
    bw = max(1, target_bytes // bytes_per_window)
    if m >= 4:
        bw = min(bw, pl.cdiv(m, 4))
    return int(min(bw, m))


# ----------------------------------------------------------------------------
# wrapper
# ----------------------------------------------------------------------------
def spatial_gating_unit(x, ln_gamma, ln_beta, w_dense, b_dense,
                        *, use_bf16_matmul=True):
    """x: (B, G, N, C)  ->  (B, G, N, C//2), matching the torch module.

    For best performance C//2 should be a multiple of 128 (lane-dense stores,
    lane-aligned u/v split); other sizes still work (full-dim blocks).
    """
    B, G, N, C = x.shape
    C2 = C // 2
    M = B * G
    in_itemsize = jnp.dtype(x.dtype).itemsize
    out_dtype = x.dtype
    out_itemsize = jnp.dtype(out_dtype).itemsize

    kind = _device_kind()
    is_v7 = "v7" in kind
    # Generation-aware tile budget: v7x has 64 MiB VMEM / 3.2 TB/s; v5e/v6e have 128 MiB.
    target_tile_bytes = (5 if is_v7 else 8) * 1024 * 1024

    BW = _choose_block_windows(M, N, C, in_itemsize, target_tile_bytes)
    M_pad = pl.cdiv(M, BW) * BW
    steps = M_pad // BW

    xr = x.reshape(M, N, C)
    if M_pad != M:
        # Pad with zero windows instead of collapsing to tiny divisor tiles;
        # LN on zeros is finite (rsqrt(eps)) and padded rows are discarded.
        xr = jnp.pad(xr, ((0, M_pad - M), (0, 0), (0, 0)))

    # Parameter prep (hoisted out of the per-step kernel body).
    w_dtype = jnp.bfloat16 if use_bf16_matmul else jnp.float32
    w_arg = w_dense.astype(w_dtype)                                  # weight cast hoisted
    bias_arg = (b_dense.astype(jnp.float32) + 1.0).reshape(N, 1)     # "+1.0" folded in
    gamma_arg = ln_gamma.astype(jnp.float32).reshape(1, C2)
    beta_arg = ln_beta.astype(jnp.float32).reshape(1, C2)

    # Derive the VMEM limit from the actual buffers (double/triple-buffered tiles
    # plus f32 intermediates: u, normalized v, bf16 v operand, f32 vm), with headroom.
    use_buffered3 = bool(is_v7 and hasattr(pl, "Buffered"))
    in_tile = BW * N * C * in_itemsize
    out_tile = BW * N * C2 * out_itemsize
    half_f32 = BW * N * C2 * 4
    param_bytes = (N * N * jnp.dtype(w_dtype).itemsize + N * 4 + 2 * C2 * 4)
    n_in_bufs = 3 if use_buffered3 else 2
    vmem_limit = (n_in_bufs * in_tile + 2 * out_tile + 4 * half_f32
                  + 2 * param_bytes + 4 * 1024 * 1024)
    vmem_cap = (48 if is_v7 else 100) * 1024 * 1024
    vmem_limit = int(min(max(vmem_limit, 16 * 1024 * 1024), vmem_cap))

    def make_x_spec():
        if use_buffered3:
            try:
                return pl.BlockSpec((BW, N, C), lambda i: (i, 0, 0),
                                    pipeline_mode=pl.Buffered(3))
            except Exception:
                pass
        return pl.BlockSpec((BW, N, C), lambda i: (i, 0, 0))

    # Advisory cost estimate for the XLA scheduler (kernel is HBM-bound).
    flops = int(2 * M_pad * N * N * C2)
    transcendentals = int(M_pad * N)
    bytes_accessed = int((M_pad * N * C) * in_itemsize
                         + (M_pad * N * C2) * out_itemsize
                         + param_bytes)
    cost = pl.CostEstimate(flops=flops, transcendentals=transcendentals,
                           bytes_accessed=bytes_accessed)

    out = pl.pallas_call(
        functools.partial(sgu_kernel, c_half=C2),
        out_shape=jax.ShapeDtypeStruct((M_pad, N, C2), out_dtype),
        grid=(steps,),
        in_specs=[
            make_x_spec(),                                   # windows tile
            pl.BlockSpec((1, C2), lambda i: (0, 0)),          # LN gamma
            pl.BlockSpec((1, C2), lambda i: (0, 0)),          # LN beta
            pl.BlockSpec((N, N), lambda i: (0, 0)),           # Dense_0 weight
            pl.BlockSpec((N, 1), lambda i: (0, 0)),           # Dense_0 bias (+1 folded)
        ],
        out_specs=pl.BlockSpec((BW, N, C2), lambda i: (i, 0, 0)),
        compiler_params=pltpu.CompilerParams(
            dimension_semantics=("parallel",),
            vmem_limit_bytes=vmem_limit,
        ),
        cost_estimate=cost,
    )(xr, gamma_arg, beta_arg, w_arg, bias_arg)

    return out[:M].reshape(B, G, N, C2)


# ----------------------------------------------------------------------------
# plain-JAX reference (mirrors the PyTorch forward, all f32)
# ----------------------------------------------------------------------------
def sgu_reference(x, ln_gamma, ln_beta, w_dense, b_dense):
    C = x.shape[-1]
    C2 = C // 2
    u, v = x[..., :C2], x[..., C2:]
    mu = jnp.mean(v, axis=-1, keepdims=True)
    var = jnp.mean((v - mu) ** 2, axis=-1, keepdims=True)
    v = (v - mu) / jnp.sqrt(var + EPS) * ln_gamma + ln_beta
    # torch: Dense_0 applied along the token axis (after permute)
    v = jnp.einsum("pq,bgqc->bgpc", w_dense, v) + b_dense[None, None, :, None]
    return u * (v + 1.0)


# ----------------------------------------------------------------------------
# demo / self-check
# ----------------------------------------------------------------------------
if __name__ == "__main__":
    key = jax.random.PRNGKey(0)
    kx, kg, kb, kw, kbias = jax.random.split(key, 5)

    # (batch, windows, tokens_per_window, channels); c//2 = 128 -> lane-aligned.
    # G=7 makes M=14 non-divisible by the chosen block, exercising the padding path.
    B, G, N, C = 2, 7, 32, 256
    x = jax.random.normal(kx, (B, G, N, C), jnp.float32)
    ln_gamma = 1.0 + 0.1 * jax.random.normal(kg, (C // 2,), jnp.float32)
    ln_beta = 0.1 * jax.random.normal(kb, (C // 2,), jnp.float32)
    w_dense = jax.random.normal(kw, (N, N), jnp.float32) / jnp.sqrt(N)
    b_dense = 0.1 * jax.random.normal(kbias, (N,), jnp.float32)

    ref = sgu_reference(x, ln_gamma, ln_beta, w_dense, b_dense)

    # Exact f32 path (numerical validation vs the reference).
    out_exact = spatial_gating_unit(x, ln_gamma, ln_beta, w_dense, b_dense,
                                    use_bf16_matmul=False)
    out_exact = jax.block_until_ready(out_exact)
    assert out_exact.shape == (B, G, N, C // 2)
    assert bool(jnp.all(jnp.isfinite(out_exact)))
    assert float(jnp.max(jnp.abs(out_exact - ref))) < 2e-3

    # Fast path: bf16 MXU operands, f32 accumulation (default).
    out = spatial_gating_unit(x, ln_gamma, ln_beta, w_dense, b_dense)
    out = jax.block_until_ready(out)
    assert out.shape == (B, G, N, C // 2)
    assert bool(jnp.all(jnp.isfinite(out)))
    rel_err = float(jnp.max(jnp.abs(out - ref) / (jnp.abs(ref) + 1.0)))
    assert rel_err < 1e-1, rel_err  # bf16 operand rounding only

    # bf16 I/O path: halves HBM traffic (the dominant cost); LN/gating math stays f32.
    x_bf16 = x.astype(jnp.bfloat16)
    out_bf16 = spatial_gating_unit(x_bf16, ln_gamma, ln_beta, w_dense, b_dense)
    out_bf16 = jax.block_until_ready(out_bf16)
    assert out_bf16.shape == (B, G, N, C // 2)
    assert out_bf16.dtype == jnp.bfloat16
    assert bool(jnp.all(jnp.isfinite(out_bf16.astype(jnp.float32))))
    rel_err_bf16 = float(jnp.max(
        jnp.abs(out_bf16.astype(jnp.float32) - ref) / (jnp.abs(ref) + 1.0)))
    assert rel_err_bf16 < 2.5e-1, rel_err_bf16

    print("KERNEL_OK")
</pallas_src>

<mosaic_0001>
module attributes {stable_mosaic.version = 11 : i64} {
  func.func @sgu_kernel(%arg0: i32, %arg1: memref<4x32x256xf32, #tpu.memory_space<vmem>>, %arg2: memref<1x128xf32, #tpu.memory_space<vmem>>, %arg3: memref<1x128xf32, #tpu.memory_space<vmem>>, %arg4: memref<32x32xf32, #tpu.memory_space<vmem>>, %arg5: memref<32x1xf32, #tpu.memory_space<vmem>>, %arg6: memref<4x32x128xf32, #tpu.memory_space<vmem>>) attributes {dimension_semantics = [#tpu.dimension_semantics<parallel>], iteration_bounds = array<i64: 4>, scalar_prefetch = 0 : i64, scratch_operands = 0 : i64, tpu.core_type = #tpu.core_type<tc>, window_params = [{transform_indices = @transform_0, window_bounds = array<i64: 4, 32, 256>}, {pipeline_mode = #tpu.pipeline_mode<synchronous>, transform_indices = @transform_1, window_bounds = array<i64: 1, 128>}, {pipeline_mode = #tpu.pipeline_mode<synchronous>, transform_indices = @transform_2, window_bounds = array<i64: 1, 128>}, {pipeline_mode = #tpu.pipeline_mode<synchronous>, transform_indices = @transform_3, window_bounds = array<i64: 32, 32>}, {pipeline_mode = #tpu.pipeline_mode<synchronous>, transform_indices = @transform_4, window_bounds = array<i64: 32, 1>}, {transform_indices = @transform_5, window_bounds = array<i64: 4, 32, 128>}]} {
    %c0 = arith.constant 0 : index
    %c0_0 = arith.constant 0 : index
    %c0_1 = arith.constant 0 : index
    %0 = vector.load %arg1[%c0, %c0_0, %c0_1] : memref<4x32x256xf32, #tpu.memory_space<vmem>>, vector<4x32x256xf32>
    %1 = vector.extract_strided_slice %0 {offsets = [0, 0, 0], sizes = [4, 32, 128], strides = [1, 1, 1]} : vector<4x32x256xf32> to vector<4x32x128xf32>
    %2 = vector.extract_strided_slice %0 {offsets = [0, 0, 128], sizes = [4, 32, 128], strides = [1, 1, 1]} : vector<4x32x256xf32> to vector<4x32x128xf32>
    %cst = arith.constant dense<0.000000e+00> : vector<4x32xf32>
    %3 = vector.multi_reduction <add>, %2, %cst [2] : vector<4x32x128xf32> to vector<4x32xf32>
    %4 = vector.shape_cast %3 : vector<4x32xf32> to vector<4x32x1xf32>
    %5 = arith.mulf %2, %2 : vector<4x32x128xf32>
    %cst_2 = arith.constant dense<0.000000e+00> : vector<4x32xf32>
    %6 = vector.multi_reduction <add>, %5, %cst_2 [2] : vector<4x32x128xf32> to vector<4x32xf32>
    %7 = vector.shape_cast %6 : vector<4x32xf32> to vector<4x32x1xf32>
    %cst_3 = arith.constant 7.812500e-03 : f32
    %8 = vector.broadcast %cst_3 : f32 to vector<4x32x1xf32>
    %9 = arith.mulf %4, %8 : vector<4x32x1xf32>
    %cst_4 = arith.constant 7.812500e-03 : f32
    %10 = vector.broadcast %cst_4 : f32 to vector<4x32x1xf32>
    %11 = arith.mulf %7, %10 : vector<4x32x1xf32>
    %12 = arith.mulf %9, %9 : vector<4x32x1xf32>
    %13 = arith.subf %11, %12 : vector<4x32x1xf32>
    %cst_5 = arith.constant 0.000000e+00 : f32
    %14 = vector.broadcast %cst_5 : f32 to vector<4x32x1xf32>
    %15 = arith.maximumf %13, %14 : vector<4x32x1xf32>
    %cst_6 = arith.constant 9.99999974E-6 : f32
    %16 = vector.broadcast %cst_6 : f32 to vector<4x32x1xf32>
    %17 = arith.addf %15, %16 : vector<4x32x1xf32>
    %18 = math.rsqrt %17 : vector<4x32x1xf32>
    %19 = vector.broadcast %9 : vector<4x32x1xf32> to vector<4x32x128xf32>
    %20 = arith.subf %2, %19 : vector<4x32x128xf32>
    %21 = vector.broadcast %18 : vector<4x32x1xf32> to vector<4x32x128xf32>
    %22 = arith.mulf %20, %21 : vector<4x32x128xf32>
    %c0_7 = arith.constant 0 : index
    %c0_8 = arith.constant 0 : index
    %23 = vector.load %arg2[%c0_7, %c0_8] : memref<1x128xf32, #tpu.memory_space<vmem>>, vector<1x128xf32>
    %24 = vector.shape_cast %23 : vector<1x128xf32> to vector<128xf32>
    %25 = vector.shape_cast %24 : vector<128xf32> to vector<1x1x128xf32>
    %26 = vector.broadcast %25 : vector<1x1x128xf32> to vector<4x32x128xf32>
    %27 = arith.mulf %22, %26 : vector<4x32x128xf32>
    %c0_9 = arith.constant 0 : index
    %c0_10 = arith.constant 0 : index
    %28 = vector.load %arg3[%c0_9, %c0_10] : memref<1x128xf32, #tpu.memory_space<vmem>>, vector<1x128xf32>
    %29 = vector.shape_cast %28 : vector<1x128xf32> to vector<128xf32>
    %30 = vector.shape_cast %29 : vector<128xf32> to vector<1x1x128xf32>
    %31 = vector.broadcast %30 : vector<1x1x128xf32> to vector<4x32x128xf32>
    %32 = arith.addf %27, %31 : vector<4x32x128xf32>
    %c0_11 = arith.constant 0 : index
    %c0_12 = arith.constant 0 : index
    %33 = vector.load %arg4[%c0_11, %c0_12] : memref<32x32xf32, #tpu.memory_space<vmem>>, vector<32x32xf32>
    %34 = vector.shape_cast %33 : vector<32x32xf32> to vector<1x32x32xf32>
    %35 = vector.broadcast %34 : vector<1x32x32xf32> to vector<4x32x32xf32>
    "tpu.trace_start"() <{level = 10 : i32, message = "bpq,bqc->bpc"}> : () -> ()
    %cst_13 = arith.constant dense<0.000000e+00> : vector<4x32x128xf32>
    %36 = tpu.matmul %35, %32, %cst_13 {dimension_numbers = #tpu.dot_dimension_numbers<[2], [1], [1], [2], [0, 0, 0, 1, 1, 2], [0], [0]>} : vector<4x32x32xf32>, vector<4x32x128xf32>, vector<4x32x128xf32> -> vector<4x32x128xf32>
    "tpu.trace_stop"() : () -> ()
    %c0_14 = arith.constant 0 : index
    %c0_15 = arith.constant 0 : index
    %37 = vector.load %arg5[%c0_14, %c0_15] : memref<32x1xf32, #tpu.memory_space<vmem>>, vector<32x1xf32>
    %38 = vector.shape_cast %37 : vector<32x1xf32> to vector<1x32x1xf32>
    %39 = vector.broadcast %38 : vector<1x32x1xf32> to vector<4x32x128xf32>
    %40 = arith.addf %36, %39 : vector<4x32x128xf32>
    %41 = arith.mulf %1, %40 : vector<4x32x128xf32>
    %c0_16 = arith.constant 0 : index
    %c0_17 = arith.constant 0 : index
    %c0_18 = arith.constant 0 : index
    %42 = vector.load %arg6[%c0_16, %c0_17, %c0_18] : memref<4x32x128xf32, #tpu.memory_space<vmem>>, vector<4x32x128xf32>
    tpu.vector_store %arg6[%c0_16, %c0_17, %c0_18], %41 {strides = array<i32>} : memref<4x32x128xf32, #tpu.memory_space<vmem>>, vector<4x32x128xf32>,
    return
  }
  func.func @transform_0(%arg0: i32) -> (i32, i32, i32) {
    %c0_i32 = arith.constant 0 : i32
    %c0_i32_0 = arith.constant 0 : i32
    %c0_i32_1 = arith.constant 0 : i32
    return %arg0, %c0_i32, %c0_i32_0 : i32, i32, i32
  }
  func.func @transform_1(%arg0: i32) -> (i32, i32) {
    %c0_i32 = arith.constant 0 : i32
    %c0_i32_0 = arith.constant 0 : i32
    %c0_i32_1 = arith.constant 0 : i32
    return %c0_i32, %c0_i32_0 : i32, i32
  }
  func.func @transform_2(%arg0: i32) -> (i32, i32) {
    %c0_i32 = arith.constant 0 : i32
    %c0_i32_0 = arith.constant 0 : i32
    %c0_i32_1 = arith.constant 0 : i32
    return %c0_i32, %c0_i32_0 : i32, i32
  }
  func.func @transform_3(%arg0: i32) -> (i32, i32) {
    %c0_i32 = arith.constant 0 : i32
    %c0_i32_0 = arith.constant 0 : i32
    %c0_i32_1 = arith.constant 0 : i32
    return %c0_i32, %c0_i32_0 : i32, i32
  }
  func.func @transform_4(%arg0: i32) -> (i32, i32) {
    %c0_i32 = arith.constant 0 : i32
    %c0_i32_0 = arith.constant 0 : i32
    %c0_i32_1 = arith.constant 0 : i32
    return %c0_i32, %c0_i32_0 : i32, i32
  }
  func.func @transform_5(%arg0: i32) -> (i32, i32, i32) {
    %c0_i32 = arith.constant 0 : i32
    %c0_i32_0 = arith.constant 0 : i32
    %c0_i32_1 = arith.constant 0 : i32
    return %arg0, %c0_i32, %c0_i32_0 : i32, i32, i32
  }
}

</mosaic_0001>

<bundles_post_ra>
// kernel: tpu_custom_call.1
= control target key start
LH: loop header
LB: loop body
LE: loop exit
PB: predicated region body
PF: predicated region fallthrough
CT: control target
= control target key end

     0   :  { %10 = vsyncpa [#allocation3], 0  ;;  %s1936_s0 = inlined_call_operand.hbm [shape: f32[16,32,256], index: 0, kind: input, shape index: {}]   ;;  %s1937_s1 = inlined_call_operand.vmem [shape: f32[1,128], index: 1, kind: input, shape index: {}]   ;;  %s1938_s2 = inlined_call_operand.vmem [shape: f32[1,128], index: 2, kind: input, shape index: {}]   ;;  %s1939_s3 = inlined_call_operand.vmem [shape: f32[32,32], index: 3, kind: input, shape index: {}]   ;;  %s1940_s4 = inlined_call_operand.vmem [shape: f32[32,1], index: 4, kind: input, shape index: {}]   ;;  %s1941_s5 = inlined_call_operand.hbm [shape: f32[16,32,128], index: 5, kind: output, shape index: {}]  }
   0x1   :  { %12 = vsyncpa [#allocation3 + $0x1], 0 }
   0x2   :  { %13 = vsyncpa [#allocation4], 0 }
   0x3   :  { %15 = vsyncpa [#allocation4 + $0x1], 0  ;;  %s1427_s18 = smov 0   ;;  %s1429_s19 = smov 0  }
   0x4   :  { %s1431_s20 = smov 0   ;;  %s1433_s21 = smov 0  }
   0x5 LB: > { %s1448_s22 = sadd.s32 4294967295, %s1388_s21   ;;  %s1049_s23 = sadd.s32 4294967294, %s1388_s21   ;;  %s1388_s21 = sphi %s1433_s21, %s1953_s21   ;;  %s1384_s20 = sphi %s1431_s20, %s1952_s20   ;;  %s1380_s19 = sphi %s1429_s19, %s1951_s19   ;;  %s1376_s18 = sphi %s1427_s18, %s1950_s18  }
   0x6   : > { %s1452_s24 = sadd.s32 1, %s1388_s21   ;;  %s28_s25 = sadd.s32 1, %s1384_s20 }
   0x7   : > { %s25_s26 = ssub.s32 %s1388_s21, %s1452_s24  ;;  %p35_p0 = scmp.ne.s32.totalorder %s1384_s20, %s1380_s19 }
   0x8   : > { %p26_p1 = scmp.eq.s32.totalorder %s25_s26, 0  ;;  %p36_p2 = scmp.eq.s32.totalorder %s1388_s21, 0 }
   0x9   : > { %p41_p3 = scmp.ne.s32.totalorder %s1380_s19, %s1376_s18  ;;  %p42_p4 = scmp.eq.s32.totalorder %s1448_s22, 0 }
   0xa   : > { %s1464_s27 = scalar_select %p26_p1, %s1384_s20, %s28_s25  }
   0xb   : > { %p1466_p5 = por %p36_p2, %p35_p0  ;;  %p1470_p6 = por %p42_p4, %p41_p3 }
   0xc   : > { %p149_p7 = scmp.eq.s32.totalorder %s1448_s22, 3  ;;  %p155_p8 = scmp.eq.s32.totalorder %s1049_s23, 3 }
   0xd   : > { %p1219_p9 = scmp.lt.s32.totalorder %s1388_s21, 4  ;;  %s187_s7 = sand.u32 1, %s1384_s20  }
   0xe   : > { %p1476_p10 = por %p149_p7, %p35_p0  ;;  %p1480_p11 = por %p155_p8, %p41_p3 }
   0xf   : > { %s1084_s8 = sshll.u32 %s1388_s21, 12  ;;  %s1052_s9 = sshll.u32 %s187_s7, 8 }
  0x10   : > { %s1945_s30 = scalar_select %p1476_p10, 1, 0 }
  0x11   : > { %s1946_s6 = scalar_select %p1480_p11, 1, 0 }
  0x12   : > { %s1489_s12 = scalar_lea.hbm %s1936_s0, %s1084_s8  ;;  %s191_s13 = scalar_lea.vmem [#allocation2], %s1052_s9 }
  0x13   : > { %s199_s14 = sshll.u32 %s191_s13, 4  ;;  %p1493_p12 = pnand %p1219_p9, %p1466_p5  ;;  %s1497_s14 = int_to_ptr.vmem [resolvable:$true] %s199_s14 }
  0x14   : > { %s1499_s16 = scalar_lea.sflag [#allocation3], %s187_s7  ;;  %s1292_s17 = scalar_lea.hbm %s1489_s12, 4096 }
  0x15   : > { %p1293_p13 = scmp.ne.s32.totalorder %s1489_s12, %s1292_s17  ;;  %p1294_p0 = pneg %p1493_p12 }
  0x16   : > { %s1297_s26 = scalar_lea.hbm %s1936_s0, 16384  ;;  %p1298_p3 = scmp.lt.u32.totalorder %s1489_s12, %s1936_s0 }
  0x17   : > { %p1295_p1 = pnand %p1294_p0, %p1293_p13  ;;  %p1299_p4 = scmp.lt.u32.totalorder %s1297_s26, %s1292_s17 }
  0x18   : > { %p1301_p7 = scmp.lt.u32.totalorder %s1292_s17, %s1489_s12 }
  0x19   : > { %p1296_p2 = pneg %p1295_p1  ;;  %p1300_p5 = por %p1299_p4, %p1298_p3 }
  0x1b   : > { %p1302_p8 = por %p1301_p7, %p1300_p5 }
  0x1d   : > { %p1303_p9 = pnand %p1302_p8, %p1296_p2 }
  0x1f   : > { %1306 = shalt.err (!%p1303_p9)
}
  0x20   : > { %s1307_s7 = scalar_lea.vmem %s1497_s14, 4096  ;;  %s1390_s9 = smov [#allocation2]  }
  0x21   : > { %p1308_p13 = scmp.ne.s32.totalorder %s1497_s14, %s1307_s7  ;;  %s1312_s10 = sshll.u32 %s1390_s9, 4  ;;  %s1313_s10 = int_to_ptr.vmem [resolvable:$false] %s1312_s10 }
  0x22   : > { %s1314_s11 = scalar_lea.vmem %s1313_s10, 8192  ;;  %p1315_p10 = scmp.lt.s32.totalorder %s1497_s14, %s1313_s10 }
  0x23   : > { %p1310_p1 = pnand %p1308_p13, %p1294_p0  ;;  %p1316_p3 = scmp.lt.s32.totalorder %s1314_s11, %s1307_s7 }
  0x25   : > { %p1311_p11 = pneg %p1310_p1  ;;  %p1317_p4 = por %p1316_p3, %p1315_p10 }
  0x27   : > { %p1318_p5 = pnand %p1317_p4, %p1311_p11 }
  0x29   : > { %1321 = shalt.err (!%p1318_p5)
}
  0x2a   : > { %s1391_s13 = smov 256   ;;  %s1392_s17 = smov 16  }
  0x2b   : > { %1214 = dma.hbm_to_vmem [thread:$0]  (!%p1493_p12), %s1489_s12, 4096, %s1497_s14, %s1499_s16, %s1391_s13, %s1391_s13, %s1392_s17  }
  0x2c   : > { %p1056_p0 = scmp.ge.s32.totalorder %s1388_s21, 1  ;;  %p207_p2 = scmp.lt.s32.totalorder %s1388_s21, 5 }
  0x2e   : > { %p208_p7 = pnand %p1056_p0, %p207_p2 }
  0x2f   : > { %s1530_s23 = sand.u32 (!%p208_p7), 1, %s1380_s19  }
  0x30   : > { %211 = sbr.rel (%p208_p7) target bundleno = 527 (0x20f), region = 40  ;;  %s1057_s25 = sshll.u32 (!%p208_p7), %s1530_s23, 8 }
  0x31   : > { %s214_s26 = scalar_lea.sflag (!%p208_p7), [#allocation3], %s1530_s23  ;;  %s1534_s28 = scalar_lea.vmem (!%p208_p7), [#allocation2], %s1057_s25 }
  0x37   : > { %1367 = dma.done.wait (%p1470_p6), %s214_s26, 4096  }
  0x38   : > { %1369 = vsyncadd (%p1470_p6), %s214_s26, 4294963200  ;;  %v1541_v0 = vld [vmem:[%s1534_s28 + $0x48] sm:$0xff]  ;;  %v1549_v2 = vld [vmem:[%s1534_s28 + $0x58] sm:$0xff]  ;;  %vm576_vm0 = vcmask 261120   ;;  %v1393_v35 = vmov 0   ;;  %s1058_s7 = sshll.u32 %s1530_s23, 7 }
  0x39   : > { %v1544_v1 = vld [vmem:[%s1534_s28 + $0x8] sm:$0xff]  ;;  %286 = vadd.xlane.f32.xlu1 %v1541_v0  ;;  %v1552_v3 = vld [vmem:[%s1534_s28 + $0x18] sm:$0xff]  ;;  %v315_v6 = vmul.f32 %v1549_v2, %v1549_v2  ;;  %v314_v7 = vmul.f32 %v1541_v0, %v1541_v0  ;;  %v1639_v32 = vld [vmem:[%s1939_s3] sm:$0xff]  ;;  %1258 = vset.pattern.permute.xlu0 %v1393_v35  ;;  %s1844_s9 = scalar_lea.vmem [#allocation5], %s1058_s7  ;;  %s1086_s10 = sshll.u32 %s1448_s22, 11 }
  0x3a   : > { %278 = vadd.xlane.f32.xlu0 %v1544_v1  ;;  %v311_v4 = vmul.f32 %v1552_v3, %v1552_v3  ;;  %v310_v5 = vmul.f32 %v1544_v1, %v1544_v1  ;;  %v1565_v8 = vld [vmem:[%s1534_s28 + $0x38] sm:$0xff]  ;;  %v1568_v9 = vld [vmem:[%s1534_s28 + $0x28] sm:$0xff]  ;;  %1127 = vmatprep.mubr.msk.f32.mxu0 %vm576_vm0, %v1639_v32  ;;  %v552_v34 = vld [vmem:[%s1940_s4] sm:$0xff]  ;;  %s976_s11 = sshll.u32 %s1844_s9, 4  ;;  %s1889_s25 = scalar_lea.hbm %s1941_s5, %s1086_s10  ;;  %s1891_s11 = int_to_ptr.vmem [resolvable:$true] %s976_s11 }
  0x3b   : > { %v1573_v10 = vld [vmem:[%s1534_s28 + $0x78] sm:$0xff]  ;;  %v1576_v11 = vld [vmem:[%s1534_s28 + $0x68] sm:$0xff]  ;;  %v313_v12 = vmul.f32 %v1565_v8, %v1565_v8  ;;  %v312_v13 = vmul.f32 %v1568_v9, %v1568_v9  ;;  %1141 = vmatprep.mubr.msk.f32.mxu1 %vm576_vm0, %v1639_v32  ;;  %1259 = vset.pattern.permute.xlu1 %v1393_v35  ;;  %v554_v36 = vld [vmem:[%s1940_s4 + $0x10] sm:$0xff]  ;;  %s962_s22 = scalar_lea.sflag [#allocation4], %s1530_s23  ;;  %p1948_p10 = scmp.ne.s32.totalorder %s1945_s30, 0 }
  0x3c   : > { %v317_v14 = vmul.f32 %v1573_v10, %v1573_v10  ;;  %v316_v15 = vmul.f32 %v1576_v11, %v1576_v11  ;;  %v1589_v16 = vld [vmem:[%s1534_s28 + $0x98] sm:$0xff]  ;;  %v1592_v17 = vld [vmem:[%s1534_s28 + $0x88] sm:$0xff]  ;;  %s1394_s26 = smov [#allocation5]  }
  0x3d   : > { %288 = vadd.xlane.f32.xlu1 %v1549_v2  ;;  %v1597_v18 = vld [vmem:[%s1534_s28 + $0xd8] sm:$0xff]  ;;  %v1600_v19 = vld [vmem:[%s1534_s28 + $0xc8] sm:$0xff]  ;;  %v319_v20 = vmul.f32 %v1589_v16, %v1589_v16  ;;  %v318_v21 = vmul.f32 %v1592_v17, %v1592_v17  ;;  %s1326_s29 = sshll.u32 %s1394_s26, 4  ;;  %s1327_s29 = int_to_ptr.vmem [resolvable:$false] %s1326_s29 }
  0x3e   : > { %280 = vadd.xlane.f32.xlu0 %v1552_v3  ;;  %v323_v22 = vmul.f32 %v1597_v18, %v1597_v18  ;;  %v322_v23 = vmul.f32 %v1600_v19, %v1600_v19  ;;  %v1613_v24 = vld [vmem:[%s1534_s28 + $0xb8] sm:$0xff]  ;;  %v1616_v25 = vld [vmem:[%s1534_s28 + $0xa8] sm:$0xff]  ;;  %s1328_s12 = scalar_lea.vmem %s1327_s29, 4096  ;;  %p1329_p8 = scmp.lt.s32.totalorder %s1891_s11, %s1327_s29 }
  0x3f   : > { %v1621_v26 = vld [vmem:[%s1534_s28 + $0xf8] sm:$0xff]  ;;  %v1624_v27 = vld [vmem:[%s1534_s28 + $0xe8] sm:$0xff]  ;;  %v321_v28 = vmul.f32 %v1613_v24, %v1613_v24  ;;  %v320_v29 = vmul.f32 %v1616_v25, %v1616_v25 }
  0x40   : > { %v325_v30 = vmul.f32 %v1621_v26, %v1621_v26  ;;  %v324_v31 = vmul.f32 %v1624_v27, %v1624_v27  ;;  %v553_v33 = vld [vmem:[%s1940_s4 + $0x8] sm:$0xff]  ;;  %v555_v37 = vld [vmem:[%s1940_s4 + $0x18] sm:$0xff] }
  0x41   : > { %328 = vadd.xlane.f32.xlu1 %v311_v4 }
  0x42   : > { %326 = vadd.xlane.f32.xlu0 %v310_v5 }
  0x45   : > { %336 = vadd.xlane.f32.xlu1 %v315_v6 }
  0x46   : > { %334 = vadd.xlane.f32.xlu0 %v314_v7 }
  0x49   : > { %284 = vadd.xlane.f32.xlu1 %v1565_v8 }
  0x4a   : > { %282 = vadd.xlane.f32.xlu0 %v1568_v9 }
  0x4d   : > { %292 = vadd.xlane.f32.xlu1 %v1573_v10 }
  0x4e   : > { %290 = vadd.xlane.f32.xlu0 %v1576_v11 }
  0x51   : > { %332 = vadd.xlane.f32.xlu1 %v313_v12 }
  0x52   : > { %330 = vadd.xlane.f32.xlu0 %v312_v13 }
  0x55   : > { %340 = vadd.xlane.f32.xlu1 %v317_v14 }
  0x56   : > { %338 = vadd.xlane.f32.xlu0 %v316_v15 }
  0x59   : > { %296 = vadd.xlane.f32.xlu1 %v1589_v16 }
  0x5a   : > { %294 = vadd.xlane.f32.xlu0 %v1592_v17 }
  0x5d   : > { %304 = vadd.xlane.f32.xlu1 %v1597_v18 }
  0x5e   : > { %302 = vadd.xlane.f32.xlu0 %v1600_v19 }
  0x61   : > { %344 = vadd.xlane.f32.xlu1 %v319_v20 }
  0x62   : > { %342 = vadd.xlane.f32.xlu0 %v318_v21 }
  0x65   : > { %352 = vadd.xlane.f32.xlu1 %v323_v22 }
  0x66   : > { %350 = vadd.xlane.f32.xlu0 %v322_v23 }
  0x69   : > { %300 = vadd.xlane.f32.xlu1 %v1613_v24 }
  0x6a   : > { %298 = vadd.xlane.f32.xlu0 %v1616_v25 }
  0x6d   : > { %308 = vadd.xlane.f32.xlu1 %v1621_v26 }
  0x6e   : > { %306 = vadd.xlane.f32.xlu0 %v1624_v27 }
  0x71   : > { %348 = vadd.xlane.f32.xlu1 %v321_v28 }
  0x72   : > { %346 = vadd.xlane.f32.xlu0 %v320_v29 }
  0x75   : > { %356 = vadd.xlane.f32.xlu1 %v325_v30 }
  0x76   : > { %354 = vadd.xlane.f32.xlu0 %v324_v31 }
  0x86   : > { %563 = vperm.xlu1 %1259, %v553_v33  }
  0x8a   : > { %568 = vperm.xlu1 %1259, %v554_v36  }
  0x8c   : > { %558 = vperm.xlu0 %1258, %v552_v34  }
  0x8e   : > { %573 = vperm.xlu1 %1259, %v555_v37  }
  0xc6   : > { %v287_v38 = vpop.xlane.xlu1 %286 }
  0xc7   : > { %v279_v39 = vpop.xlane.xlu0 %278  ;;  %v1659_v44 = vmul.f32 0.0078125, %v287_v38 }
  0xc8   : > { %v1657_v42 = vmul.f32 0.0078125, %v279_v39 }
  0xc9   : > { %v394_v54 = vmul.f32 %v1659_v44, %v1659_v44 }
  0xca   : > { %v289_v40 = vpop.xlane.xlu1 %288  ;;  %v390_v48 = vmul.f32 %v1657_v42, %v1657_v42 }
  0xcb   : > { %v281_v41 = vpop.xlane.xlu0 %280  ;;  %v1661_v45 = vmul.f32 0.0078125, %v289_v40 }
  0xcc   : > { %v359_v43 = vmul.f32 0.0078125, %v281_v41  ;;  %v1685_v41 = vld [vmem:[%s1937_s1] ss:$0 sm:$0xff] }
  0xcd   : > { %v395_v55 = vmul.f32 %v1661_v45, %v1661_v45 }
  0xce   : > { %v329_v46 = vpop.xlane.xlu1 %328  ;;  %v391_v49 = vmul.f32 %v359_v43, %v359_v43  ;;  %v471_v37 = vsub.f32 %v1552_v3, %v359_v43 }
  0xcf   : > { %v327_v47 = vpop.xlane.xlu0 %326  ;;  %v375_v50 = vmul.f32 0.0078125, %v329_v46 }
  0xd0   : > { %v374_v51 = vmul.f32 0.0078125, %v327_v47  ;;  %v470_v47 = vsub.f32 %v1544_v1, %v1657_v42  ;;  %v475_v1 = vsub.f32 %v1549_v2, %v1661_v45 }
  0xd1   : > { %v407_v52 = vsub.f32 %v375_v50, %v391_v49 }
  0xd2   : > { %v406_v53 = vsub.f32 %v374_v51, %v390_v48  ;;  %v337_v56 = vpop.xlane.xlu1 %336 }
  0xd3   : > { %v335_v57 = vpop.xlane.xlu0 %334  ;;  %v423_v58 = vmax.f32 %v407_v52, 0.0  ;;  %v379_v60 = vmul.f32 0.0078125, %v337_v56 }
  0xd4   : > { %v422_v59 = vmax.f32 %v406_v53, 0.0  ;;  %v378_v61 = vmul.f32 0.0078125, %v335_v57 }
  0xd5   : > { %v439_v62 = vadd.f32 1e-05, %v423_v58  ;;  %v411_v4 = vsub.f32 %v379_v60, %v395_v55  ;;  %v1696_v55 = vld [vmem:[%s1938_s2] ss:$0 sm:$0xff] }
  0xd6   : > { %v438_v63 = vadd.f32 1e-05, %v422_v59  ;;  %v410_v5 = vsub.f32 %v378_v61, %v394_v54  ;;  %v285_v6 = vpop.xlane.xlu1 %284 }
  0xd7   : > { %v283_v7 = vpop.xlane.xlu0 %282  ;;  %1260 = vrsqrt.f32 %v439_v62  ;;  %v427_v12 = vmax.f32 %v411_v4, 0.0  ;;  %v1669_v22 = vmul.f32 0.0078125, %v285_v6 }
  0xd8   : > { %v426_v13 = vmax.f32 %v410_v5, 0.0  ;;  %1262 = vrsqrt.f32 %v438_v63  ;;  %v1671_v23 = vmul.f32 0.0078125, %v283_v7  ;;  %v474_v63 = vsub.f32 %v1541_v0, %v1659_v44 }
  0xd9   : > { %v443_v14 = vadd.f32 1e-05, %v427_v12  ;;  %v393_v33 = vmul.f32 %v1669_v22, %v1669_v22 }
  0xda   : > { %v442_v15 = vadd.f32 1e-05, %v426_v13  ;;  %v293_v20 = vpop.xlane.xlu1 %292  ;;  %v392_v34 = vmul.f32 %v1671_v23, %v1671_v23 }
  0xdb   : > { %v291_v21 = vpop.xlane.xlu0 %290  ;;  %1264 = vrsqrt.f32 %v443_v14  ;;  %v1673_v28 = vmul.f32 0.0078125, %v293_v20 }
  0xdc   : > { %1266 = vrsqrt.f32 %v442_v15  ;;  %v1675_v29 = vmul.f32 0.0078125, %v291_v21 }
  0xdd   : > { %v397_v48 = vmul.f32 %v1673_v28, %v1673_v28 }
  0xde   : > { %v333_v30 = vpop.xlane.xlu1 %332  ;;  %v396_v49 = vmul.f32 %v1675_v29, %v1675_v29 }
  0xdf   : > { %v331_v31 = vpop.xlane.xlu0 %330  ;;  %v377_v35 = vmul.f32 0.0078125, %v333_v30 }
  0xe0   : > { %v376_v36 = vmul.f32 0.0078125, %v331_v31 }
  0xe1   : > { %v1261_v38 = vpop.eup %1260  ;;  %v409_v39 = vsub.f32 %v377_v35, %v393_v33 }
  0xe2   : > { %v408_v40 = vsub.f32 %v376_v36, %v392_v34  ;;  %v1263_v46 = vpop.eup %1262  ;;  %v341_v50 = vpop.xlane.xlu1 %340  ;;  %v487_v43 = vmul.f32 %v1261_v38, %v471_v37 }
  0xe3   : > { %v339_v3 = vpop.xlane.xlu0 %338  ;;  %v425_v51 = vmax.f32 %v409_v39, 0.0  ;;  %v381_v53 = vmul.f32 0.0078125, %v341_v50  ;;  %v486_v42 = vmul.f32 %v1263_v46, %v470_v47  ;;  %v473_v50 = vsub.f32 %v1565_v8, %v1669_v22 }
  0xe4   : > { %v424_v52 = vmax.f32 %v408_v40, 0.0  ;;  %v380_v54 = vmul.f32 0.0078125, %v339_v3  ;;  %v510_v56 = vmul.f32 %v1685_v41, %v487_v43 }
  0xe5   : > { %v1265_v57 = vpop.eup %1264  ;;  %v441_v58 = vadd.f32 1e-05, %v425_v51  ;;  %v413_v60 = vsub.f32 %v381_v53, %v397_v48  ;;  %v509_v6 = vmul.f32 %v1685_v41, %v486_v42 }
  0xe6   : > { %v440_v59 = vadd.f32 1e-05, %v424_v52  ;;  %v412_v61 = vsub.f32 %v380_v54, %v396_v49  ;;  %v1267_v62 = vpop.eup %1266  ;;  %v297_v4 = vpop.xlane.xlu1 %296  ;;  %v533_v7 = vadd.f32 %v1696_v55, %v510_v56  ;;  %v491_v12 = vmul.f32 %v1265_v57, %v475_v1 }
  0xe7   : > { %v295_v5 = vpop.xlane.xlu0 %294  ;;  %1268 = vrsqrt.f32 %v441_v58  ;;  %v429_v2 = vmax.f32 %v413_v60, 0.0  ;;  %v532_v13 = vadd.f32 %v1696_v55, %v509_v6  ;;  %v490_v14 = vmul.f32 %v1267_v62, %v474_v63 }
  0xe8   : > { %v428_v45 = vmax.f32 %v412_v61, 0.0  ;;  %1270 = vrsqrt.f32 %v440_v59  ;;  %v1707_v44 = vmul.f32 0.0078125, %v297_v4  ;;  %v1709_v33 = vmul.f32 0.0078125, %v295_v5 }
  0xe9   : > { %v445_v15 = vadd.f32 1e-05, %v429_v2  ;;  %v1175_v30 = vpack.c.bf16 %v533_v7, %v532_v13  ;;  %v513_v0 = vmul.f32 %v1685_v41, %v490_v14  ;;  %v514_v34 = vmul.f32 %v1685_v41, %v491_v12 }
  0xea   : > { %v444_v20 = vadd.f32 1e-05, %v428_v45  ;;  %v305_v21 = vpop.xlane.xlu1 %304  ;;  %v399_v46 = vmul.f32 %v1707_v44, %v1707_v44  ;;  %v398_v47 = vmul.f32 %v1709_v33, %v1709_v33  ;;  %v472_v54 = vsub.f32 %v1568_v9, %v1671_v23 }
  0xeb   : > { %v303_v31 = vpop.xlane.xlu0 %302  ;;  %1272 = vrsqrt.f32 %v445_v15  ;;  %1176 = vmatprep.subr.bf16.mxu0 %v1175_v30  ;;  %v536_v35 = vadd.f32 %v1696_v55, %v513_v0  ;;  %v1713_v36 = vmul.f32 0.0078125, %v305_v21  ;;  %v537_v39 = vadd.f32 %v1696_v55, %v514_v34 }
  0xec   : > { %1274 = vrsqrt.f32 %v444_v20  ;;  %1178 = vmatpush3.bf16.msra.mxu0 %v1175_v30  ;;  %v1715_v37 = vmul.f32 0.0078125, %v303_v31  ;;  %v477_v61 = vsub.f32 %v1573_v10, %v1673_v28  ;;  %v476_v2 = vsub.f32 %v1576_v11, %v1675_v29 }
  0xed   : > { %v1183_v3 = vpack.c.bf16 %v537_v39, %v536_v35  ;;  %v403_v1 = vmul.f32 %v1713_v36, %v1713_v36 }
  0xee   : > { %v345_v38 = vpop.xlane.xlu1 %344  ;;  %v402_v42 = vmul.f32 %v1715_v37, %v1715_v37 }
  0xef   : > { %v343_v40 = vpop.xlane.xlu0 %342  ;;  %v383_v48 = vmul.f32 0.0078125, %v345_v38  ;;  %1184 = vmatprep.subr.bf16.mxu1 %v1183_v3 }
  0xf0   : > { %v382_v49 = vmul.f32 0.0078125, %v343_v40  ;;  %1186 = vmatpush3.bf16.msra.mxu1 %v1183_v3 }
  0xf1   : > { %v1269_v43 = vpop.eup %1268  ;;  %v415_v51 = vsub.f32 %v383_v48, %v399_v46  ;;  %v1748_v46 = vld [vmem:[%s1939_s3 + $0x8] sm:$0xff] }
  0xf2   : > { %v414_v52 = vsub.f32 %v382_v49, %v398_v47  ;;  %v1271_v53 = vpop.eup %1270  ;;  %v353_v56 = vpop.xlane.xlu1 %352  ;;  %v489_v58 = vmul.f32 %v1269_v43, %v473_v50  ;;  %v1758_v43 = vld [vmem:[%s1939_s3 + $0x10] sm:$0xff] }
  0xf3   : > { %v351_v57 = vpop.xlane.xlu0 %350  ;;  %v431_v59 = vmax.f32 %v415_v51, 0.0  ;;  %v387_v22 = vmul.f32 0.0078125, %v353_v56  ;;  %v488_v62 = vmul.f32 %v1271_v53, %v472_v54 }
  0xf4   : > { %v430_v8 = vmax.f32 %v414_v52, 0.0  ;;  %v386_v60 = vmul.f32 0.0078125, %v351_v57  ;;  %v512_v9 = vmul.f32 %v1685_v41, %v489_v58 }
  0xf5   : > { %v1273_v23 = vpop.eup %1272  ;;  %v447_v63 = vadd.f32 1e-05, %v431_v59  ;;  %v419_v5 = vsub.f32 %v387_v22, %v403_v1  ;;  %v511_v13 = vmul.f32 %v1685_v41, %v488_v62  ;;  %v479_v1 = vsub.f32 %v1589_v16, %v1707_v44  ;;  %v1773_v59 = vld [vmem:[%s1939_s3 + $0x18] sm:$0xff] }
  0xf6   : > { %v446_v4 = vadd.f32 1e-05, %v430_v8  ;;  %v418_v6 = vsub.f32 %v386_v60, %v402_v42  ;;  %v1275_v7 = vpop.eup %1274  ;;  %v301_v45 = vpop.xlane.xlu1 %300  ;;  %v535_v14 = vadd.f32 %v1696_v55, %v512_v9  ;;  %v493_v15 = vmul.f32 %v1273_v23, %v477_v61 }
  0xf7   : > { %v299_v12 = vpop.xlane.xlu0 %298  ;;  %1276 = vrsqrt.f32 %v447_v63  ;;  %v435_v10 = vmax.f32 %v419_v5, 0.0  ;;  %v534_v20 = vadd.f32 %v1696_v55, %v511_v13  ;;  %v492_v21 = vmul.f32 %v1275_v7, %v476_v2 }
  0xf8   : > { %v434_v28 = vmax.f32 %v418_v6, 0.0  ;;  %1278 = vrsqrt.f32 %v446_v4  ;;  %v1739_v29 = vmul.f32 0.0078125, %v301_v45  ;;  %v1741_v38 = vmul.f32 0.0078125, %v299_v12 }
  0xf9   : > { %v451_v30 = vadd.f32 1e-05, %v435_v10  ;;  %v1179_v34 = vpack.c.bf16 %v535_v14, %v534_v20  ;;  %v515_v11 = vmul.f32 %v1685_v41, %v492_v21  ;;  %v516_v39 = vmul.f32 %v1685_v41, %v493_v15 }
  0xfa   : > { %v450_v31 = vadd.f32 1e-05, %v434_v28  ;;  %v309_v0 = vpop.xlane.xlu1 %308  ;;  %v401_v51 = vmul.f32 %v1739_v29, %v1739_v29  ;;  %v400_v52 = vmul.f32 %v1741_v38, %v1741_v38  ;;  %v478_v22 = vsub.f32 %v1592_v17, %v1709_v33 }
  0xfb   : > { %v307_v35 = vpop.xlane.xlu0 %306  ;;  %1280 = vrsqrt.f32 %v451_v30  ;;  %1180 = vmatprep.subr.bf16.mxu0 %v1179_v34  ;;  %v538_v40 = vadd.f32 %v1696_v55, %v515_v11  ;;  %v1750_v47 = vmul.f32 0.0078125, %v309_v0  ;;  %v539_v50 = vadd.f32 %v1696_v55, %v516_v39 }
  0xfc   : > { %1282 = vrsqrt.f32 %v450_v31  ;;  %1182 = vmatpush3.bf16.msra.mxu0 %v1179_v34  ;;  %v1752_v48 = vmul.f32 0.0078125, %v307_v35  ;;  %v483_v5 = vsub.f32 %v1597_v18, %v1713_v36  ;;  %v482_v17 = vsub.f32 %v1600_v19, %v1715_v37 }
  0xfd   : > { %v1187_v42 = vpack.c.bf16 %v539_v50, %v538_v40  ;;  %v405_v16 = vmul.f32 %v1750_v47, %v1750_v47  ;;  %v481_v39 = vsub.f32 %v1613_v24, %v1739_v29 }
  0xfe   : > { %v349_v49 = vpop.xlane.xlu1 %348  ;;  %v404_v44 = vmul.f32 %v1752_v48, %v1752_v48 }
  0xff   : > { %v347_v3 = vpop.xlane.xlu0 %346  ;;  %v385_v53 = vmul.f32 0.0078125, %v349_v49  ;;  %1128 = vmatmul.mubr.msk.f32.vlgmr.msra.gmra.mrb[0].mxu0 %vm576_vm0, %v1748_v46  ;;  %1188 = vmatprep.subr.bf16.mxu1 %v1187_v42  ;;  %v480_v49 = vsub.f32 %v1616_v25, %v1741_v38 }
 0x100   : > { %v384_v54 = vmul.f32 0.0078125, %v347_v3  ;;  %1130 = vmatprep.mubr.msk.f32.mxu0 %vm576_vm0, %v1758_v43  ;;  %1190 = vmatpush3.bf16.msra.mxu1 %v1187_v42 }
 0x101   : > { %v1277_v56 = vpop.eup %1276  ;;  %v417_v57 = vsub.f32 %v385_v53, %v401_v51 }
 0x102   : > { %v416_v58 = vsub.f32 %v384_v54, %v400_v52  ;;  %v1279_v8 = vpop.eup %1278  ;;  %v357_v60 = vpop.xlane.xlu1 %356  ;;  %v495_v62 = vmul.f32 %v1277_v56, %v479_v1  ;;  %v485_v52 = vsub.f32 %v1621_v26, %v1750_v47  ;;  %v484_v54 = vsub.f32 %v1624_v27, %v1752_v48 }
 0x103   : > { %v355_v61 = vpop.xlane.xlu0 %354  ;;  %v433_v9 = vmax.f32 %v417_v57, 0.0  ;;  %v389_v63 = vmul.f32 0.0078125, %v357_v60  ;;  %v494_v33 = vmul.f32 %v1279_v8, %v478_v22  ;;  %1131 = vmatmul.mubr.msk.f32.gmra.mrb[2].mxu0 %vm576_vm0, %v1773_v59  ;;  %1142 = vmatmul.mubr.msk.f32.vlgmr.msra.gmra.mrb[0].mxu1 %vm576_vm0, %v1748_v46  ;;  %v248_v8 = vld [vmem:[%s1534_s28 + $0x10] sm:$0xff] }
 0x104   : > { %v432_v23 = vmax.f32 %v416_v58, 0.0  ;;  %v388_v4 = vmul.f32 0.0078125, %v355_v61  ;;  %v518_v6 = vmul.f32 %v1685_v41, %v495_v62  ;;  %1155 = vmatprep.mubr.msk.f32.mxu0 %vm576_vm0, %v1639_v32  ;;  %1144 = vmatprep.mubr.msk.f32.mxu1 %vm576_vm0, %v1758_v43 }
 0x105   : > { %v1281_v7 = vpop.eup %1280  ;;  %v449_v2 = vadd.f32 1e-05, %v433_v9  ;;  %v421_v12 = vsub.f32 %v389_v63, %v405_v16  ;;  %v517_v18 = vmul.f32 %v1685_v41, %v494_v33  ;;  %v252_v9 = vld [vmem:[%s1534_s28 + $0x30] sm:$0xff]  ;;  %v250_v63 = vld [vmem:[%s1534_s28 + $0x20] sm:$0xff] }
 0x106   : > { %v448_v45 = vadd.f32 1e-05, %v432_v23  ;;  %v420_v13 = vsub.f32 %v388_v4, %v404_v44  ;;  %v1283_v14 = vpop.eup %1282  ;;  %v541_v36 = vadd.f32 %v1696_v55, %v518_v6  ;;  %v499_v19 = vmul.f32 %v1281_v7, %v483_v5  ;;  %v256_v5 = vld [vmem:[%s1534_s28 + $0x50] sm:$0xff] }
 0x107   : > { %1284 = vrsqrt.f32 %v449_v2  ;;  %v437_v37 = vmax.f32 %v421_v12, 0.0  ;;  %v498_v28 = vmul.f32 %v1283_v14, %v482_v17  ;;  %v540_v15 = vadd.f32 %v1696_v55, %v517_v18  ;;  %1145 = vmatmul.mubr.msk.f32.gmra.mrb[2].mxu1 %vm576_vm0, %v1773_v59  ;;  %v254_v2 = vld [vmem:[%s1534_s28 + $0x40] sm:$0xff] }
 0x108   : > { %v436_v10 = vmax.f32 %v420_v13, 0.0  ;;  %1286 = vrsqrt.f32 %v448_v45  ;;  %v522_v20 = vmul.f32 %v1685_v41, %v499_v19  ;;  %1169 = vmatprep.mubr.msk.f32.mxu1 %vm576_vm0, %v1639_v32  ;;  %v260_v19 = vld [vmem:[%s1534_s28 + $0x70] sm:$0xff] }
 0x109   : > { %v453_v21 = vadd.f32 1e-05, %v437_v37  ;;  %v521_v31 = vmul.f32 %v1685_v41, %v498_v28  ;;  %v1191_v0 = vpack.c.bf16 %v541_v36, %v540_v15 }
 0x10a   : > { %v452_v30 = vadd.f32 1e-05, %v436_v10  ;;  %v545_v34 = vadd.f32 %v1696_v55, %v522_v20  ;;  %v258_v10 = vld [vmem:[%s1534_s28 + $0x60] sm:$0xff] }
 0x10b   : > { %1288 = vrsqrt.f32 %v453_v21  ;;  %v544_v35 = vadd.f32 %v1696_v55, %v521_v31  ;;  %1192 = vmatprep.subr.bf16.mxu0 %v1191_v0  ;;  %v1836_v58 = vpop.permute.xlu0 %558 }
 0x10c   : > { %1290 = vrsqrt.f32 %v452_v30  ;;  %1194 = vmatpush3.bf16.msra.mxu0 %v1191_v0  ;;  %v264_v30 = vld [vmem:[%s1534_s28 + $0x90] sm:$0xff] }
 0x10d   : > { %v1199_v11 = vpack.c.bf16 %v545_v34, %v544_v35  ;;  %v262_v34 = vld [vmem:[%s1534_s28 + $0x80] sm:$0xff] }
 0x10f   : > { %1200 = vmatprep.subr.bf16.mxu1 %v1199_v11 }
 0x110   : > { %1202 = vmatpush3.bf16.msra.mxu1 %v1199_v11 }
 0x111   : > { %v1285_v40 = vpop.eup %1284 }
 0x112   : > { %v1287_v50 = vpop.eup %1286  ;;  %v497_v3 = vmul.f32 %v1285_v40, %v481_v39 }
 0x113   : > { %v496_v51 = vmul.f32 %v1287_v50, %v480_v49  ;;  %v268_v49 = vld [vmem:[%s1534_s28 + $0xb0] sm:$0xff] }
 0x114   : > { %v520_v32 = vmul.f32 %v1685_v41, %v497_v3  ;;  %v272_v3 = vld [vmem:[%s1534_s28 + $0xd0] sm:$0xff] }
 0x115   : > { %v1289_v53 = vpop.eup %1288  ;;  %v519_v1 = vmul.f32 %v1685_v41, %v496_v51 }
 0x116   : > { %v1291_v24 = vpop.eup %1290  ;;  %v543_v29 = vadd.f32 %v1696_v55, %v520_v32  ;;  %v501_v42 = vmul.f32 %v1289_v53, %v485_v52  ;;  %v266_v53 = vld [vmem:[%s1534_s28 + $0xa0] sm:$0xff] }
 0x117   : > { %v542_v25 = vadd.f32 %v1696_v55, %v519_v1  ;;  %v500_v38 = vmul.f32 %v1291_v24, %v484_v54  ;;  %v270_v1 = vld [vmem:[%s1534_s28 + $0xc0] sm:$0xff] }
 0x118   : > { %v524_v56 = vmul.f32 %v1685_v41, %v501_v42 }
 0x119   : > { %v1195_v57 = vpack.c.bf16 %v543_v29, %v542_v25  ;;  %v523_v26 = vmul.f32 %v1685_v41, %v500_v38  ;;  %v564_v41 = vpop.permute.xlu1 %563 }
 0x11a   : > { %v547_v47 = vadd.f32 %v1696_v55, %v524_v56 }
 0x11b   : > { %1196 = vmatprep.subr.bf16.mxu0 %v1195_v57  ;;  %v546_v27 = vadd.f32 %v1696_v55, %v523_v26  ;;  %v276_v26 = vld [vmem:[%s1534_s28 + $0xf0] sm:$0xff] }
 0x11c   : > { %1198 = vmatpush3.bf16.msra.mxu0 %v1195_v57 }
 0x11d   : > { %v1203_v48 = vpack.c.bf16 %v547_v47, %v546_v27  ;;  %v1833_v55 = vpop.permute.xlu1 %568 }
 0x11f   : > { %1156 = vmatmul.mubr.msk.f32.vlgmr.msra.gmra.mrb[4].mxu0 %vm576_vm0, %v1748_v46  ;;  %1204 = vmatprep.subr.bf16.mxu1 %v1203_v48 }
 0x120   : > { %1206 = vmatpush3.bf16.msra.mxu1 %v1203_v48  ;;  %1158 = vmatprep.mubr.msk.f32.mxu0 %vm576_vm0, %v1758_v43  ;;  %v274_v48 = vld [vmem:[%s1534_s28 + $0xe0] sm:$0xff] }
 0x123   : > { %1159 = vmatmul.mubr.msk.f32.gmra.mrb[6].mxu0 %vm576_vm0, %v1773_v59  ;;  %1170 = vmatmul.mubr.msk.f32.vlgmr.msra.gmra.mrb[4].mxu1 %vm576_vm0, %v1748_v46  ;;  %v246_v46 = vld [vmem:[%s1534_s28] sm:$0xff]  ;;  %s1322_s28 = scalar_lea.vmem %s1891_s11, 2048 }
 0x124   : > { %1172 = vmatprep.mubr.msk.f32.mxu1 %vm576_vm0, %v1758_v43  ;;  %v1841_v43 = vpop.permute.xlu1 %573  ;;  %p1323_p6 = scmp.ne.s32.totalorder %s1891_s11, %s1322_s28  ;;  %p1330_p9 = scmp.lt.s32.totalorder %s1328_s12, %s1322_s28 }
 0x126   : > { %p1324_p11 = pnand %p1323_p6, %p1948_p10  ;;  %p1331_p13 = por %p1330_p9, %p1329_p8 }
 0x127   : > { %1173 = vmatmul.mubr.msk.f32.gmra.mrb[6].mxu1 %vm576_vm0, %v1773_v59 }
 0x128   : > { %p1325_p12 = pneg %p1324_p11 }
 0x12a   : > { %p1332_p1 = pnand %p1331_p13, %p1325_p12 }
 0x1d2   : > { %v1129_v22 = vpop.f32.mrb[0].mxu0 }
 0x1d3   : > { %v661_v16 = vadd.f32 %v1129_v22, %v564_v41  ;;  %v655_v44 = vpop.f32.mrb[1].mxu0 }
 0x1d4   : > { %v656_v60 = vadd.f32 %v655_v44, %v1836_v58 }
 0x1d5   : > { %v930_v61 = vmul.f32 %v661_v16, %v248_v8 }
 0x1d6   : > { %v929_v59 = vmul.f32 %v656_v60, %v246_v46  ;;  %v1132_v62 = vpop.f32.mrb[2].mxu0  ;;  %v1143_v17 = vpop.f32.mrb[0].mxu1 }
 0x1d7   : > { %946 = vst [vmem:[%s1844_s9 + $0x8] sm:$0xff] %v930_v61  ;;  %v671_v23 = vadd.f32 %v1132_v62, %v1841_v43  ;;  %v665_v4 = vpop.f32.mrb[3].mxu0  ;;  %v746_v6 = vadd.f32 %v1143_v17, %v564_v41  ;;  %v740_v7 = vpop.f32.mrb[1].mxu1 }
 0x1d8   : > { %945 = vst [vmem:[%s1844_s9] sm:$0xff] %v929_v59  ;;  %v666_v33 = vadd.f32 %v665_v4, %v1833_v55  ;;  %v741_v12 = vadd.f32 %v740_v7, %v1836_v58 }
 0x1d9   : > { %v932_v45 = vmul.f32 %v671_v23, %v252_v9  ;;  %v934_v14 = vmul.f32 %v746_v6, %v256_v5 }
 0x1da   : > { %v931_v13 = vmul.f32 %v666_v33, %v250_v63  ;;  %v933_v18 = vmul.f32 %v741_v12, %v254_v2  ;;  %v1146_v36 = vpop.f32.mrb[2].mxu1 }
 0x1db   : > { %948 = vst [vmem:[%s1844_s9 + $0x18] sm:$0xff] %v932_v45  ;;  %950 = vst [vmem:[%s1844_s9 + $0x28] sm:$0xff] %v934_v14  ;;  %v756_v37 = vadd.f32 %v1146_v36, %v1841_v43  ;;  %v750_v28 = vpop.f32.mrb[3].mxu1 }
 0x1dc   : > { %947 = vst [vmem:[%s1844_s9 + $0x10] sm:$0xff] %v931_v13  ;;  %949 = vst [vmem:[%s1844_s9 + $0x20] sm:$0xff] %v933_v18  ;;  %v751_v15 = vadd.f32 %v750_v28, %v1833_v55 }
 0x1dd   : > { %v936_v20 = vmul.f32 %v756_v37, %v260_v19 }
 0x1de   : > { %v935_v21 = vmul.f32 %v751_v15, %v258_v10 }
 0x1df   : > { %952 = vst [vmem:[%s1844_s9 + $0x38] sm:$0xff] %v936_v20 }
 0x1e0   : > { %951 = vst [vmem:[%s1844_s9 + $0x30] sm:$0xff] %v935_v21 }
 0x1f2   : > { %v1157_v31 = vpop.f32.mrb[4].mxu0 }
 0x1f3   : > { %v831_v0 = vadd.f32 %v1157_v31, %v564_v41  ;;  %v825_v35 = vpop.f32.mrb[5].mxu0 }
 0x1f4   : > { %v826_v11 = vadd.f32 %v825_v35, %v1836_v58 }
 0x1f5   : > { %v938_v39 = vmul.f32 %v831_v0, %v264_v30 }
 0x1f6   : > { %v937_v40 = vmul.f32 %v826_v11, %v262_v34  ;;  %v1160_v50 = vpop.f32.mrb[6].mxu0  ;;  %v1171_v51 = vpop.f32.mrb[4].mxu1 }
 0x1f7   : > { %954 = vst [vmem:[%s1844_s9 + $0x48] sm:$0xff] %v938_v39  ;;  %v841_v52 = vadd.f32 %v1160_v50, %v1841_v43  ;;  %v916_v32 = vadd.f32 %v1171_v51, %v564_v41  ;;  %v835_v54 = vpop.f32.mrb[7].mxu0  ;;  %v910_v24 = vpop.f32.mrb[5].mxu1 }
 0x1f8   : > { %953 = vst [vmem:[%s1844_s9 + $0x40] sm:$0xff] %v937_v40  ;;  %v836_v29 = vadd.f32 %v835_v54, %v1833_v55  ;;  %v911_v42 = vadd.f32 %v910_v24, %v1836_v58 }
 0x1f9   : > { %v940_v25 = vmul.f32 %v841_v52, %v268_v49  ;;  %v942_v38 = vmul.f32 %v916_v32, %v272_v3 }
 0x1fa   : > { %v939_v56 = vmul.f32 %v836_v29, %v266_v53  ;;  %v941_v57 = vmul.f32 %v911_v42, %v270_v1  ;;  %v1174_v47 = vpop.f32.mrb[6].mxu1 }
 0x1fb   : > { %956 = vst [vmem:[%s1844_s9 + $0x58] sm:$0xff] %v940_v25  ;;  %958 = vst [vmem:[%s1844_s9 + $0x68] sm:$0xff] %v942_v38  ;;  %v926_v27 = vadd.f32 %v1174_v47, %v1841_v43  ;;  %v920_v41 = vpop.f32.mrb[7].mxu1 }
 0x1fc   : > { %955 = vst [vmem:[%s1844_s9 + $0x50] sm:$0xff] %v939_v56  ;;  %957 = vst [vmem:[%s1844_s9 + $0x60] sm:$0xff] %v941_v57  ;;  %v921_v58 = vadd.f32 %v920_v41, %v1833_v55 }
 0x1fd   : > { %v944_v8 = vmul.f32 %v926_v27, %v276_v26 }
 0x1fe   : > { %v943_v22 = vmul.f32 %v921_v58, %v274_v48 }
 0x1ff   : > { %960 = vst [vmem:[%s1844_s9 + $0x78] sm:$0xff] %v944_v8 }
 0x200   : > { %959 = vst [vmem:[%s1844_s9 + $0x70] sm:$0xff] %v943_v22 }
 0x201   : > { %1335 = shalt.err (!%p1332_p1)
}
 0x202   : > { %s1336_s14 = scalar_lea.hbm %s1889_s25, 2048  ;;  %s1340_s8 = scalar_lea.hbm %s1941_s5, 8192 }
 0x203   : > { %p1337_p3 = scmp.ne.s32.totalorder %s1889_s25, %s1336_s14  ;;  %p1341_p0 = scmp.lt.u32.totalorder %s1889_s25, %s1941_s5 }
 0x204   : > { %p1342_p2 = scmp.lt.u32.totalorder %s1340_s8, %s1336_s14  ;;  %p1344_p6 = scmp.lt.u32.totalorder %s1336_s14, %s1889_s25 }
 0x205   : > { %p1338_p4 = pnand %p1337_p3, %p1948_p10 }
 0x206   : > { %p1343_p7 = por %p1342_p2, %p1341_p0 }
 0x207   : > { %p1339_p5 = pneg %p1338_p4 }
 0x208   : > { %p1345_p11 = por %p1344_p6, %p1343_p7 }
 0x20a   : > { %p1346_p12 = pnand %p1345_p11, %p1339_p5 }
 0x20c   : > { %1349 = shalt.err (!%p1346_p12)
}
 0x20d   : > { %s1395_s10 = smov 128   ;;  %s1396_s13 = smov 8  }
 0x20e   : > { %1209 = dma.vmem_to_hbm [thread:$0]  (%p1948_p10), %s1891_s11, 2048, %s1889_s25, %s962_s22, %s1395_s10, %s1395_s10, %s1396_s13  }
 0x20f PF: > { %p1220_p8 = scmp.ge.s32.totalorder %s1388_s21, 2  ;;  %s991_s17 = sand.u32 1, %s1376_s18  }
 0x210   : > { %p1949_p9 = scmp.ne.s32.totalorder %s1946_s6, 0  ;;  %s992_s28 = scalar_lea.sflag [#allocation4], %s991_s17 }
 0x212   : > { %p1216_p13 = pnand %p1220_p8, %p1949_p9 }
 0x214   : > { %1371 = dma.done.wait (!%p1216_p13), %s992_s28, 2048  }
 0x215   : > { %1373 = vsyncadd (!%p1216_p13), %s992_s28, 4294965248  ;;  %p18_p1 = scmp.ge.s32.totalorder %s1452_s24, 6   ;;  %s1950_s18 = smov %s1380_s19 }
 0x216   : > { %s1951_s19 = smov %s1384_s20  ;;  %s1952_s20 = smov %s1464_s27 }
 0x217   : > { %s1953_s21 = smov %s1452_s24  ;;  %20 = sbr.rel (!%p18_p1) target bundleno = 5 (0x5), region = 85 }
 0x21e   :  { %997 = vsyncpa [#allocation3], 1 }
 0x21f   :  { %999 = vsyncpa [#allocation3 + $0x1], 1 }
 0x220   :  { %1000 = vsyncpa [#allocation4], 1 }
 0x221   :  { %1002 = vsyncpa [#allocation4 + $0x1], 1 }

</bundles_post_ra>
